<compile_context>
chip_gen: v7x
topology: tpu7x:2x2x1
jax: 0.10.0
libtpu: 0.0.40
codegen_flags: <defaults>
</compile_context>

<pallas_src>
import functools

import jax
import jax.numpy as jnp
from jax.experimental import pallas as pl
from jax.experimental.pallas import tpu as pltpu


def _round_up(x, m):
    return (x + m - 1) // m * m


def _cdiv(a, b):
    return (a + b - 1) // b


def _vmem_capacity_bytes():
    """Generation-aware VMEM capacity (128 MiB v5e/v6e, 64 MiB per-core v7x)."""
    try:
        info = pltpu.get_tpu_info()
        cap = getattr(info, "vmem_capacity_bytes", None)
        if cap:
            return int(cap)
    except Exception:
        pass
    return 64 << 20  # conservative fallback (v7x per-TensorCore VMEM)


def _conv_gemm_kernel(a_ref, w_ref, scale_ref, shift_ref, o_ref, acc_ref, *, relu):
    """One (tm, tn) output tile of the im2col GEMM; K tiled on grid axis 2.

    a_ref:     (tm, tk)   im2col patch rows (compute dtype)
    w_ref:     (tk, tn)   conv weights in GEMM layout (compute dtype)
    scale_ref: (1, tn)    folded BN scale (f32, applied in the f32 epilogue)
    shift_ref: (1, tn)    folded BN shift (f32)
    o_ref:     (tm, tn)   lane-dense output tile
    acc_ref:   (tm, tn)   f32 accumulator scratch (persists across K steps)
    """
    k = pl.program_id(2)

    @pl.when(k == 0)
    def _():
        acc_ref[...] = jnp.zeros_like(acc_ref)

    acc_ref[...] += jnp.dot(a_ref[...], w_ref[...],
                            preferred_element_type=jnp.float32)

    @pl.when(k == pl.num_programs(2) - 1)
    def _():
        y = acc_ref[...] * scale_ref[...] + shift_ref[...]
        if relu:
            y = jnp.maximum(y, 0.0)
        o_ref[...] = y.astype(o_ref.dtype)


def basic_conv(
    x_nchw,
    weight_oihw,
    gamma,
    beta,
    running_mean,
    running_var,
    *,
    stride=1,
    padding=0,
    eps=1e-5,
    relu=True,
    bn=True,
    compute_dtype=jnp.bfloat16,   # MXU peak dtype on all gens; f32 accumulate
    out_dtype=None,               # defaults to input dtype
    tm=None,                      # output rows per step (auto if None)
    tn=None,                      # output cols per step (multiple of 128)
    tk=None,                      # contraction chunk per step
):
    """BasicConv forward: conv2d(bias=False) -> BN(eval) -> ReLU."""
    N, Cin, H, W = x_nchw.shape
    Cout, _, KH, KW = weight_oihw.shape
    Ho = (H + 2 * padding - KH) // stride + 1
    Wo = (W + 2 * padding - KW) // stride + 1
    out_dtype = x_nchw.dtype if out_dtype is None else out_dtype

    # ---- Glue (plain XLA): layout conversion + spatial pad + im2col unfold ----
    x = jnp.transpose(x_nchw, (0, 2, 3, 1))                    # NCHW -> NHWC
    x = jnp.pad(x, ((0, 0), (padding, padding), (padding, padding), (0, 0)))
    cols = []
    for kh in range(KH):
        for kw in range(KW):
            cols.append(
                jax.lax.slice(
                    x,
                    (0, kh, kw, 0),
                    (N, kh + (Ho - 1) * stride + 1, kw + (Wo - 1) * stride + 1, Cin),
                    (1, stride, stride, 1),
                )
            )                                                  # (N, Ho, Wo, Cin)
    patches = jnp.concatenate(cols, axis=-1)                   # (N, Ho, Wo, KH*KW*Cin)

    K_dim = KH * KW * Cin
    M = N * Ho * Wo

    # Weights OIHW -> (KH*KW*Cin, Cout), row order matching the patch layout.
    w = jnp.transpose(weight_oihw, (2, 3, 1, 0)).reshape(K_dim, Cout)

    # BN (eval-mode running stats) -> per-channel scale/shift, applied in the
    # f32 epilogue (NOT folded into bf16 weights -> no amplified quant error).
    if bn:
        scale = (gamma / jnp.sqrt(running_var + eps)).astype(jnp.float32)
        shift = (beta - running_mean * scale).astype(jnp.float32)
    else:
        scale = jnp.ones((Cout,), jnp.float32)
        shift = jnp.zeros((Cout,), jnp.float32)

    # ---- TPU-friendly tiling -------------------------------------------------
    cbytes = jnp.dtype(compute_dtype).itemsize
    obytes = jnp.dtype(out_dtype).itemsize
    kpack = {1: 32, 2: 16, 4: 8}.get(cbytes, 8)    # sublane packing per dtype

    vmem_cap = _vmem_capacity_bytes()
    budget = (vmem_cap * 3) // 4                   # per-step footprint budget

    K_pad = _round_up(K_dim, kpack)
    Cout_p = _round_up(Cout, 128)                  # lane-dense output stores

    # N (output channel) tile
    if tn is None:
        tn_ = min(Cout_p, 512)
    else:
        tn_ = min(max(128, _round_up(int(tn), 128)), Cout_p)
    # K (contraction) tile
    if tk is None:
        tk_ = min(K_pad, 2048)
    else:
        tk_ = min(max(kpack, _round_up(int(tk), kpack)), K_pad)
    # M (output row) tile
    tm_user = tm is not None
    tm_ = 512 if tm is None else max(8, int(tm) - int(tm) % 8)
    tm_ = max(8, min(tm_, _round_up(M, 8)))
    tm_ -= tm_ % 8

    # Megacore: aim for >= 4 steps on the parallel M axis (v7x has 2 TCs).
    if not tm_user:
        while tm_ > 64 and _cdiv(M, tm_) < 4:
            tm_ = max(8, (tm_ // 2) // 8 * 8)
        if tm_ >= 256:
            tm_ -= tm_ % 128                       # 128-aligned (v5e MXU shape)

    def _step_bytes(tm__, tk__, tn__):
        # ALL pipelined operands are double-buffered by the Pallas pipeline.
        return (2 * tm__ * tk__ * cbytes           # A tile
                + 2 * tk__ * tn__ * cbytes         # W tile
                + 2 * 2 * tn__ * 4                 # scale + shift (f32)
                + 2 * tm__ * tn__ * obytes         # output tile
                + tm__ * tn__ * 4)                 # f32 accumulator scratch

    # Shrink auto-chosen tiles until the footprint fits the generation budget.
    while _step_bytes(tm_, tk_, tn_) > budget:
        if tk is None and tk_ > 8 * kpack:
            tk_ = max(kpack, _round_up(tk_ // 2, kpack))
        elif tm is None and tm_ > 128:
            tm_ = max(8, (tm_ // 2) // 8 * 8)
        elif tn is None and tn_ > 128:
            tn_ = max(128, (tn_ // 2) // 128 * 128)
        elif tm is None and tm_ > 8:
            tm_ = max(8, (tm_ // 2) // 8 * 8)
        else:
            break

    step_bytes = _step_bytes(tm_, tk_, tn_)
    # Never below the real footprint; generation-aware upper bound.
    vmem_limit = int(min(max(step_bytes + (8 << 20), 48 << 20), vmem_cap))
    vmem_limit = max(vmem_limit, step_bytes + (1 << 20))

    M_full = _round_up(M, tm_)
    K_full = _round_up(K_dim, tk_)
    Cout_full = _round_up(Cout, tn_)

    a = patches.reshape(M, K_dim)
    a = jnp.pad(a, ((0, M_full - M), (0, K_full - K_dim))).astype(compute_dtype)
    w = jnp.pad(w, ((0, K_full - K_dim), (0, Cout_full - Cout))).astype(compute_dtype)
    scale_p = jnp.pad(scale, (0, Cout_full - Cout)).reshape(1, Cout_full)
    shift_p = jnp.pad(shift, (0, Cout_full - Cout)).reshape(1, Cout_full)

    grid = (M_full // tm_, Cout_full // tn_, K_full // tk_)

    cost = pl.CostEstimate(
        flops=2 * M * K_dim * Cout,
        transcendentals=0,
        bytes_accessed=(M_full * K_full * cbytes
                        + K_full * Cout_full * cbytes
                        + M_full * Cout_full * obytes
                        + 2 * Cout_full * 4),
    )

    kernel = functools.partial(_conv_gemm_kernel, relu=relu)

    out = pl.pallas_call(
        kernel,
        out_shape=jax.ShapeDtypeStruct((M_full, Cout_full), out_dtype),
        grid_spec=pltpu.PrefetchScalarGridSpec(
            num_scalar_prefetch=0,
            grid=grid,
            in_specs=[
                pl.BlockSpec((tm_, tk_), lambda i, j, k: (i, k)),   # A
                pl.BlockSpec((tk_, tn_), lambda i, j, k: (k, j)),   # W
                pl.BlockSpec((1, tn_), lambda i, j, k: (0, j)),     # scale
                pl.BlockSpec((1, tn_), lambda i, j, k: (0, j)),     # shift
            ],
            out_specs=pl.BlockSpec((tm_, tn_), lambda i, j, k: (i, j)),
            scratch_shapes=[pltpu.VMEM((tm_, tn_), jnp.float32)],
        ),
        compiler_params=pltpu.CompilerParams(
            dimension_semantics=("parallel", "parallel", "arbitrary"),
            vmem_limit_bytes=vmem_limit,
        ),
        cost_estimate=cost,
    )(a, w, scale_p, shift_p)

    out = out[:M, :Cout].reshape(N, Ho, Wo, Cout)
    return jnp.transpose(out, (0, 3, 1, 2))                    # NHWC -> NCHW


if __name__ == "__main__":
    eps = 1e-5

    def ref_fn(x, weight, gamma, beta, mean, var, stride, padding, relu=True):
        y = jax.lax.conv_general_dilated(
            x, weight, (stride, stride),
            [(padding, padding), (padding, padding)],
            dimension_numbers=("NCHW", "OIHW", "NCHW"))
        s = gamma / jnp.sqrt(var + eps)
        b = beta - mean * s
        y = y * s[None, :, None, None] + b[None, :, None, None]
        return jnp.maximum(y, 0.0) if relu else y

    # --- BasicConv(in_planes=4, out_planes=8, kernel_size=3, stride=1, padding=1)
    N, Cin, H, W = 2, 4, 16, 16
    Cout, K, stride, padding = 8, 3, 1, 1

    key = jax.random.PRNGKey(0)
    k1, k2, k3, k4, k5, k6 = jax.random.split(key, 6)
    x = jax.random.normal(k1, (N, Cin, H, W), jnp.float32)
    weight = jax.random.normal(k2, (Cout, Cin, K, K), jnp.float32) * 0.1
    gamma = jax.random.uniform(k3, (Cout,), jnp.float32, minval=0.5, maxval=1.5)
    beta = jax.random.normal(k4, (Cout,), jnp.float32) * 0.1
    running_mean = jax.random.normal(k5, (Cout,), jnp.float32) * 0.1
    running_var = jax.random.uniform(k6, (Cout,), jnp.float32, minval=0.5, maxval=1.5)

    ref = ref_fn(x, weight, gamma, beta, running_mean, running_var, stride, padding)

    # Default bf16 MXU path (f32 accumulation, f32 BN/ReLU epilogue).
    out_bf16 = basic_conv(
        x, weight, gamma, beta, running_mean, running_var,
        stride=stride, padding=padding, eps=eps, relu=True, bn=True,
    )
    jax.block_until_ready(out_bf16)
    assert out_bf16.shape == (N, Cout, H, W), out_bf16.shape
    assert jnp.allclose(out_bf16, ref, atol=1.5e-1, rtol=1.5e-1), "bf16 mismatch"

    # f32 compute path, tight tolerance.
    out_f32 = basic_conv(
        x, weight, gamma, beta, running_mean, running_var,
        stride=stride, padding=padding, eps=eps, relu=True, bn=True,
        compute_dtype=jnp.float32,
    )
    jax.block_until_ready(out_f32)
    assert out_f32.shape == (N, Cout, H, W), out_f32.shape
    assert jnp.allclose(out_f32, ref, atol=1e-4, rtol=1e-4), "f32 mismatch"

    # Larger config with forced small tiles so the M / Cout / K grid tiling,
    # padded edges, and the accumulator init/finalize paths are all exercised
    # (grid = 4 x 2 x 3 steps: M=64/tm=16, Cout=160->256/tn=128, K=288->384/tk=128).
    N2, Cin2, H2, W2 = 1, 32, 8, 8
    Cout2, K2, stride2, padding2 = 160, 3, 1, 1
    kk = jax.random.split(jax.random.PRNGKey(1), 6)
    x2 = jax.random.normal(kk[0], (N2, Cin2, H2, W2), jnp.float32)
    w2 = jax.random.normal(kk[1], (Cout2, Cin2, K2, K2), jnp.float32) * 0.05
    g2 = jax.random.uniform(kk[2], (Cout2,), jnp.float32, minval=0.5, maxval=1.5)
    b2 = jax.random.normal(kk[3], (Cout2,), jnp.float32) * 0.1
    m2 = jax.random.normal(kk[4], (Cout2,), jnp.float32) * 0.1
    v2 = jax.random.uniform(kk[5], (Cout2,), jnp.float32, minval=0.5, maxval=1.5)

    ref2 = ref_fn(x2, w2, g2, b2, m2, v2, stride2, padding2)
    out2 = basic_conv(
        x2, w2, g2, b2, m2, v2,
        stride=stride2, padding=padding2, eps=eps, relu=True, bn=True,
        compute_dtype=jnp.float32, tm=16, tn=128, tk=128,
    )
    jax.block_until_ready(out2)
    assert out2.shape == (N2, Cout2, H2, W2), out2.shape
    assert jnp.allclose(out2, ref2, atol=1e-3, rtol=1e-3), "tiled-grid mismatch"

    print("KERNEL_OK")
</pallas_src>

<mosaic_0001>
module attributes {stable_mosaic.version = 11 : i64} {
  func.func @_conv_gemm_kernel(%arg0: i32, %arg1: i32, %arg2: i32, %arg3: memref<128x48xbf16, #tpu.memory_space<vmem>>, %arg4: memref<48x128xbf16, #tpu.memory_space<vmem>>, %arg5: memref<1x128xf32, #tpu.memory_space<vmem>>, %arg6: memref<1x128xf32, #tpu.memory_space<vmem>>, %arg7: memref<128x128xf32, #tpu.memory_space<vmem>>, %arg8: memref<128x128xf32, #tpu.memory_space<vmem>>) attributes {dimension_semantics = [#tpu.dimension_semantics<parallel>, #tpu.dimension_semantics<parallel>, #tpu.dimension_semantics<arbitrary>], iteration_bounds = array<i64: 4, 1, 1>, scalar_prefetch = 0 : i64, scratch_operands = 1 : i64, tpu.core_type = #tpu.core_type<tc>, window_params = [{transform_indices = @transform_0, window_bounds = array<i64: 128, 48>}, {transform_indices = @transform_1, window_bounds = array<i64: 48, 128>}, {transform_indices = @transform_2, window_bounds = array<i64: 1, 128>}, {transform_indices = @transform_3, window_bounds = array<i64: 1, 128>}, {transform_indices = @transform_4, window_bounds = array<i64: 128, 128>}]} {
    %c0_i32 = arith.constant 0 : i32
    %0 = arith.cmpi eq, %arg2, %c0_i32 : i32
    %1 = arith.extui %0 : i1 to i32
    %c0_i32_0 = arith.constant 0 : i32
    %2 = arith.cmpi ne, %1, %c0_i32_0 : i32
    scf.if %2 {
      %cst_10 = arith.constant 0.000000e+00 : f32
      %12 = vector.broadcast %cst_10 : f32 to vector<128x128xf32>
      %c0_11 = arith.constant 0 : index
      %c0_12 = arith.constant 0 : index
      %13 = vector.load %arg8[%c0_11, %c0_12] : memref<128x128xf32, #tpu.memory_space<vmem>>, vector<128x128xf32>
      tpu.vector_store %arg8[%c0_11, %c0_12], %12 {strides = array<i32>} : memref<128x128xf32, #tpu.memory_space<vmem>>, vector<128x128xf32>,
    } else {
    }
    %c0 = arith.constant 0 : index
    %c0_1 = arith.constant 0 : index
    %3 = vector.load %arg8[%c0, %c0_1] : memref<128x128xf32, #tpu.memory_space<vmem>>, vector<128x128xf32>
    %c0_2 = arith.constant 0 : index
    %c0_3 = arith.constant 0 : index
    %4 = vector.load %arg3[%c0_2, %c0_3] : memref<128x48xbf16, #tpu.memory_space<vmem>>, vector<128x48xbf16>
    %c0_4 = arith.constant 0 : index
    %c0_5 = arith.constant 0 : index
    %5 = vector.load %arg4[%c0_4, %c0_5] : memref<48x128xbf16, #tpu.memory_space<vmem>>, vector<48x128xbf16>
    %cst = arith.constant dense<0.000000e+00> : vector<128x128xf32>
    %6 = tpu.matmul %4, %5, %cst {dimension_numbers = #tpu.dot_dimension_numbers<[1], [0], [0], [1], [0, 0, 1, 1], [], []>} : vector<128x48xbf16>, vector<48x128xbf16>, vector<128x128xf32> -> vector<128x128xf32>
    %7 = arith.addf %3, %6 : vector<128x128xf32>
    %c0_6 = arith.constant 0 : index
    %c0_7 = arith.constant 0 : index
    %8 = vector.load %arg8[%c0_6, %c0_7] : memref<128x128xf32, #tpu.memory_space<vmem>>, vector<128x128xf32>
    tpu.vector_store %arg8[%c0_6, %c0_7], %7 {strides = array<i32>} : memref<128x128xf32, #tpu.memory_space<vmem>>, vector<128x128xf32>,
    %c0_i32_8 = arith.constant 0 : i32
    %9 = arith.cmpi eq, %arg2, %c0_i32_8 : i32
    %10 = arith.extui %9 : i1 to i32
    %c0_i32_9 = arith.constant 0 : i32
    %11 = arith.cmpi ne, %10, %c0_i32_9 : i32
    scf.if %11 {
      %c0_10 = arith.constant 0 : index
      %c0_11 = arith.constant 0 : index
      %12 = vector.load %arg8[%c0_10, %c0_11] : memref<128x128xf32, #tpu.memory_space<vmem>>, vector<128x128xf32>
      %c0_12 = arith.constant 0 : index
      %c0_13 = arith.constant 0 : index
      %13 = vector.load %arg5[%c0_12, %c0_13] : memref<1x128xf32, #tpu.memory_space<vmem>>, vector<1x128xf32>
      %14 = vector.broadcast %13 : vector<1x128xf32> to vector<128x128xf32>
      %15 = arith.mulf %12, %14 : vector<128x128xf32>
      %c0_14 = arith.constant 0 : index
      %c0_15 = arith.constant 0 : index
      %16 = vector.load %arg6[%c0_14, %c0_15] : memref<1x128xf32, #tpu.memory_space<vmem>>, vector<1x128xf32>
      %17 = vector.broadcast %16 : vector<1x128xf32> to vector<128x128xf32>
      %18 = arith.addf %15, %17 : vector<128x128xf32>
      %cst_16 = arith.constant 0.000000e+00 : f32
      %19 = vector.broadcast %cst_16 : f32 to vector<128x128xf32>
      %20 = arith.maximumf %18, %19 : vector<128x128xf32>
      %c0_17 = arith.constant 0 : index
      %c0_18 = arith.constant 0 : index
      %21 = vector.load %arg7[%c0_17, %c0_18] : memref<128x128xf32, #tpu.memory_space<vmem>>, vector<128x128xf32>
      tpu.vector_store %arg7[%c0_17, %c0_18], %20 {strides = array<i32>} : memref<128x128xf32, #tpu.memory_space<vmem>>, vector<128x128xf32>,
    } else {
    }
    return
  }
  func.func @transform_0(%arg0: i32, %arg1: i32, %arg2: i32) -> (i32, i32) {
    %c0_i32 = arith.constant 0 : i32
    return %arg0, %arg2 : i32, i32
  }
  func.func @transform_1(%arg0: i32, %arg1: i32, %arg2: i32) -> (i32, i32) {
    %c0_i32 = arith.constant 0 : i32
    return %arg2, %arg1 : i32, i32
  }
  func.func @transform_2(%arg0: i32, %arg1: i32, %arg2: i32) -> (i32, i32) {
    %c0_i32 = arith.constant 0 : i32
    %c0_i32_0 = arith.constant 0 : i32
    return %c0_i32, %arg1 : i32, i32
  }
  func.func @transform_3(%arg0: i32, %arg1: i32, %arg2: i32) -> (i32, i32) {
    %c0_i32 = arith.constant 0 : i32
    %c0_i32_0 = arith.constant 0 : i32
    return %c0_i32, %arg1 : i32, i32
  }
  func.func @transform_4(%arg0: i32, %arg1: i32, %arg2: i32) -> (i32, i32) {
    %c0_i32 = arith.constant 0 : i32
    return %arg0, %arg1 : i32, i32
  }
}

</mosaic_0001>

<bundles_post_ra>
// kernel: tpu_custom_call.1
= control target key start
LH: loop header
LB: loop body
LE: loop exit
PB: predicated region body
PF: predicated region fallthrough
CT: control target
= control target key end

     0   :  { %9 = vsyncpa [#allocation4], 0  ;;  %s1244_s0 = inlined_call_operand.vmem [shape: bf16[512,48], index: 0, kind: input, shape index: {}]   ;;  %s1245_s1 = inlined_call_operand.vmem [shape: bf16[48,128], index: 1, kind: input, shape index: {}]   ;;  %s1246_s2 = inlined_call_operand.vmem [shape: f32[1,128], index: 2, kind: input, shape index: {}]   ;;  %s1247_s3 = inlined_call_operand.vmem [shape: f32[1,128], index: 3, kind: input, shape index: {}]   ;;  %s1248_s4 = inlined_call_operand.hbm [shape: f32[512,128], index: 4, kind: output, shape index: {}]  }
   0x1   :  { %11 = vsyncpa [#allocation4 + $0x1], 0  ;;  %s1048_s15 = smov 0   ;;  %s1050_s16 = smov 0  }
   0x2   :  { %s1052_s17 = smov 0   ;;  %s1054_s18 = smov 0  }
   0x3   :  { %s1056_s19 = smov 0   ;;  %s1058_s20 = smov 0  }
   0x4 LB: > { %s795_s21 = sadd.s32 4294967295, %s1018_s20   ;;  %s796_s22 = sadd.s32 4294967294, %s1018_s20   ;;  %s1018_s20 = sphi %s1058_s20, %s17_s20   ;;  %s1014_s19 = sphi %s1056_s19, %s1255_s19   ;;  %s1010_s18 = sphi %s1054_s18, %s1254_s18   ;;  %s1006_s17 = sphi %s1052_s17, %s1253_s17   ;;  %s1002_s16 = sphi %s1050_s16, %s1252_s16   ;;  %s998_s15 = sphi %s1048_s15, %s1251_s15  }
   0x5   : > { %s36_s23 = sadd.s32 1, %s1014_s19  ;;  %s153_s24 = sadd.s32 1, %s1006_s17 }
   0x6   : > { %p38_p0 = scmp.ge.s32.totalorder %s36_s23, 4  ;;  %p163_p1 = scmp.ne.s32.totalorder %s1006_s17, %s1002_s16 }
   0x7   : > { %p164_p2 = scmp.eq.s32.totalorder %s795_s21, 3  ;;  %p169_p3 = scmp.ne.s32.totalorder %s1002_s16, %s998_s15 }
   0x8   : > { %s1257_s23 = smov (%p38_p0, %s36_s23), 0  ;;  %p170_p5 = scmp.eq.s32.totalorder %s796_s22, 3 }
   0x9   : > { %p1088_p4 = por %p164_p2, %p163_p1  ;;  %s148_s26 = ssub.s32 %s1014_s19, %s1257_s23 }
   0xa   : > { %p802_p6 = scmp.ge.s32.totalorder %s1018_s20, 1  ;;  %p151_p7 = scmp.eq.s32.totalorder %s148_s26, 0 }
   0xb   : > { %p1095_p8 = por %p170_p5, %p169_p3  ;;  %p224_p9 = scmp.lt.s32.totalorder %s1018_s20, 5 }
   0xc   : > { %s1101_s28 = scalar_select %p151_p7, %s1006_s17, %s153_s24  }
   0xd   : > { %p225_p10 = pnand %p802_p6, %p224_p9 }
   0xe   : > { %v929_v0 = vld [vmem:[%s1245_s1] sm:$0xff] (!%p225_p10)   ;;  %s804_s5 = sshll.u32 (!%p225_p10), %s1010_s18, 4  ;;  %v930_v1 = vld [vmem:[%s1245_s1 + $0x8] sm:$0xff] (!%p225_p10)   ;;  %v931_v2 = vld [vmem:[%s1245_s1 + $0x10] sm:$0xff] (!%p225_p10)   ;;  %vm409_vm0 = vcmask (!%p225_p10), 392192   ;;  %s264_s14 = sand.u32 (!%p225_p10), 1, %s1002_s16  }
   0xf   : > { %228 = sbr.rel (%p225_p10) target bundleno = 272 (0x110), region = 36  ;;  %p268_p11 = scmp.lt.s32.totalorder (!%p225_p10), %s804_s5, 63  ;;  %844 = vmatprep.subr.bf16.mxu0 (!%p225_p10), %v929_v0  ;;  %866 = vmatprep.subr.bf16.mxu1 (!%p225_p10), %v929_v0  ;;  %v1128_v11 = vld [vmem:[%s1246_s2] ss:$0 sm:$0xff] (!%p225_p10) }
  0x10   : > { %845 = vmatpush3.bf16.msra.mxu0 (!%p225_p10), %v929_v0  ;;  %869 = vmatpush3.bf16.msra.mxu1 (!%p225_p10), %v929_v0  ;;  %v1133_v13 = vld [vmem:[%s1247_s3] ss:$0 sm:$0xff] (!%p225_p10)  ;;  %s803_s29 = sshll.u32 (!%p225_p10), %s264_s14, 7  ;;  %s1198_s9 = scalar_lea.sflag (!%p225_p10), [#allocation4], %s264_s14 }
  0x11   : > { %846 = vmatprep.subr.bf16.mxu0 (!%p225_p10), %v930_v1  ;;  %867 = vmatprep.subr.bf16.mxu1 (!%p225_p10), %v930_v1  ;;  %s1153_s30 = scalar_lea.vmem (!%p225_p10), [#allocation3], %s803_s29  ;;  %s1020_s11 = smov (!%p225_p10), [#allocation3]  }
  0x12   : > { %s675_s6 = sshll.u32 (!%p225_p10), %s1153_s30, 4  ;;  %s944_s12 = sshll.u32 (!%p225_p10), %s1020_s11, 4  ;;  %s1188_s6 = int_to_ptr.vmem [resolvable:$true] %s675_s6  ;;  %s945_s12 = int_to_ptr.vmem [resolvable:$false] %s944_s12 }
  0x13   : > { %p947_p1 = scmp.lt.s32.totalorder (!%p225_p10), %s1188_s6, %s945_s12 }
  0x14   : > { %847 = vmatpush3.bf16.msra.mxu0 (!%p225_p10), %v930_v1  ;;  %870 = vmatpush3.bf16.msra.mxu1 (!%p225_p10), %v930_v1 }
  0x15   : > { %848 = vmatprep.subr.bf16.mxu0 (!%p225_p10), %v931_v2  ;;  %868 = vmatprep.subr.bf16.mxu1 (!%p225_p10), %v931_v2 }
  0x16   : > { %s1259_s5 = smov (!%p268_p11, %s804_s5), 63 }
  0x17   : > { %s805_s10 = sshll.u32 %s1259_s5, 2  ;;  %s832_s5 = sshll.u32 %s1010_s18, 11 }
  0x18   : > { %s274_s13 = scalar_lea.vmem %s1244_s0, %s805_s10  ;;  %849 = vmatpush3.bf16.msra.mxu0 %v931_v2  ;;  %871 = vmatpush3.bf16.msra.mxu1 %v931_v2  ;;  %s1186_s8 = scalar_lea.hbm %s1248_s4, %s832_s5 }
  0x19   : > { %v932_v3 = vld [vmem:[%s274_s13] sm:$0xff]   ;;  %v934_v5 = vld [vmem:[%s274_s13 + $0x8] sm:$0xff]   ;;  %v936_v7 = vld [vmem:[%s274_s13 + $0x10] sm:$0xff]   ;;  %s940_s10 = scalar_lea.vmem %s1188_s6, 2048 }
  0x1a   : > { %v933_v4 = vld [vmem:[%s274_s13 + $0x20] sm:$0xff]   ;;  %850 = vmatprep.mubr.msk.bf16.mxu0 %vm409_vm0, %v932_v3  ;;  %v935_v6 = vld [vmem:[%s274_s13 + $0x28] sm:$0xff]   ;;  %v937_v8 = vld [vmem:[%s274_s13 + $0x30] sm:$0xff]   ;;  %p941_p12 = scmp.ne.s32.totalorder %s1188_s6, %s940_s10 }
  0x1b   : > { %858 = vmatprep.mubr.msk.bf16.mxu1 %vm409_vm0, %v933_v4  ;;  %851 = vmatmul.mubr.msk.bf16.vlgmr.msra.gmra.mrb[0].mxu0 %vm409_vm0, %v934_v5  ;;  %v938_v9 = vld [vmem:[%s274_s13 + $0x18] sm:$0xff]  }
  0x1c   : > { %859 = vmatmul.mubr.msk.bf16.vlgmr.msra.gmra.mrb[0].mxu1 %vm409_vm0, %v935_v6  ;;  %854 = vmatprep.mubr.msk.bf16.mxu0 %vm409_vm0, %v936_v7  ;;  %v939_v10 = vld [vmem:[%s274_s13 + $0x38] sm:$0xff]   ;;  %p942_p13 = pnand %p941_p12, %p1088_p4  ;;  %s946_s13 = scalar_lea.vmem %s945_s12, 4096 }
  0x1d   : > { %862 = vmatprep.mubr.msk.bf16.mxu1 %vm409_vm0, %v937_v8  ;;  %p948_p2 = scmp.lt.s32.totalorder %s946_s13, %s940_s10 }
  0x1e   : > { %p943_p0 = pneg %p942_p13 }
  0x1f   : > { %p949_p3 = por %p948_p2, %p947_p1 }
  0x21   : > { %p950_p5 = pnand %p949_p3, %p943_p0 }
  0x23   : > { %855 = vmatmul.mubr.msk.bf16.gmra.mrb[4].mxu0 %vm409_vm0, %v938_v9 }
  0x24   : > { %863 = vmatmul.mubr.msk.bf16.gmra.mrb[4].mxu1 %vm409_vm0, %v939_v10 }
  0xee   : > { %v852_v12 = vpop.f32.mrb[0].mxu0 }
  0xef   : > { %v860_v14 = vpop.f32.mrb[0].mxu1  ;;  %v591_v15 = vmul.f32 %v852_v12, %v1128_v11  ;;  %v468_v17 = vpop.f32.mrb[1].mxu0 }
  0xf0   : > { %v599_v16 = vmul.f32 %v860_v14, %v1128_v11  ;;  %v500_v18 = vpop.f32.mrb[1].mxu1  ;;  %v589_v19 = vmul.f32 %v1128_v11, %v468_v17  ;;  %v853_v21 = vpop.f32.mrb[2].mxu0 }
  0xf1   : > { %v597_v20 = vmul.f32 %v1128_v11, %v500_v18  ;;  %v861_v22 = vpop.f32.mrb[2].mxu1  ;;  %v614_v23 = vadd.f32 %v1133_v13, %v591_v15  ;;  %v592_v25 = vmul.f32 %v853_v21, %v1128_v11  ;;  %v471_v27 = vpop.f32.mrb[3].mxu0 }
  0xf2   : > { %v622_v24 = vadd.f32 %v1133_v13, %v599_v16  ;;  %v600_v26 = vmul.f32 %v861_v22, %v1128_v11  ;;  %v503_v28 = vpop.f32.mrb[3].mxu1  ;;  %v612_v29 = vadd.f32 %v1133_v13, %v589_v19  ;;  %v590_v31 = vmul.f32 %v1128_v11, %v471_v27 }
  0xf3   : > { %v620_v30 = vadd.f32 %v1133_v13, %v597_v20  ;;  %v598_v32 = vmul.f32 %v1128_v11, %v503_v28  ;;  %v630_v33 = vmax.f32 %v614_v23, 0.0  ;;  %v615_v35 = vadd.f32 %v1133_v13, %v592_v25 }
  0xf4   : > { %v638_v34 = vmax.f32 %v622_v24, 0.0  ;;  %v623_v36 = vadd.f32 %v1133_v13, %v600_v26  ;;  %v628_v37 = vmax.f32 %v612_v29, 0.0  ;;  %v613_v39 = vadd.f32 %v1133_v13, %v590_v31 }
  0xf5   : > { %v636_v38 = vmax.f32 %v620_v30, 0.0  ;;  %v621_v40 = vadd.f32 %v1133_v13, %v598_v32  ;;  %646 = vst [vmem:[%s1153_s30 + $0x10] sm:$0xff] %v630_v33  ;;  %v631_v41 = vmax.f32 %v615_v35, 0.0 }
  0xf6   : > { %654 = vst [vmem:[%s1153_s30 + $0x50] sm:$0xff] %v638_v34  ;;  %v639_v42 = vmax.f32 %v623_v36, 0.0  ;;  %644 = vst [vmem:[%s1153_s30] sm:$0xff] %v628_v37  ;;  %v629_v43 = vmax.f32 %v613_v39, 0.0  ;;  %v856_v45 = vpop.f32.mrb[4].mxu0 }
  0xf7   : > { %652 = vst [vmem:[%s1153_s30 + $0x40] sm:$0xff] %v636_v38  ;;  %v637_v44 = vmax.f32 %v621_v40, 0.0  ;;  %v864_v46 = vpop.f32.mrb[4].mxu1  ;;  %647 = vst [vmem:[%s1153_s30 + $0x18] sm:$0xff] %v631_v41  ;;  %v595_v47 = vmul.f32 %v856_v45, %v1128_v11  ;;  %v484_v49 = vpop.f32.mrb[5].mxu0 }
  0xf8   : > { %655 = vst [vmem:[%s1153_s30 + $0x58] sm:$0xff] %v639_v42  ;;  %v603_v48 = vmul.f32 %v864_v46, %v1128_v11  ;;  %v516_v50 = vpop.f32.mrb[5].mxu1  ;;  %645 = vst [vmem:[%s1153_s30 + $0x8] sm:$0xff] %v629_v43  ;;  %v593_v51 = vmul.f32 %v1128_v11, %v484_v49  ;;  %v857_v53 = vpop.f32.mrb[6].mxu0 }
  0xf9   : > { %653 = vst [vmem:[%s1153_s30 + $0x48] sm:$0xff] %v637_v44  ;;  %v601_v52 = vmul.f32 %v1128_v11, %v516_v50  ;;  %v865_v54 = vpop.f32.mrb[6].mxu1  ;;  %v618_v55 = vadd.f32 %v1133_v13, %v595_v47  ;;  %v596_v57 = vmul.f32 %v857_v53, %v1128_v11  ;;  %v487_v59 = vpop.f32.mrb[7].mxu0 }
  0xfa   : > { %v626_v56 = vadd.f32 %v1133_v13, %v603_v48  ;;  %v604_v58 = vmul.f32 %v865_v54, %v1128_v11  ;;  %v519_v60 = vpop.f32.mrb[7].mxu1  ;;  %v616_v61 = vadd.f32 %v1133_v13, %v593_v51  ;;  %v594_v63 = vmul.f32 %v1128_v11, %v487_v59 }
  0xfb   : > { %v624_v62 = vadd.f32 %v1133_v13, %v601_v52  ;;  %v602_v0 = vmul.f32 %v1128_v11, %v519_v60  ;;  %v634_v1 = vmax.f32 %v618_v55, 0.0  ;;  %v619_v3 = vadd.f32 %v1133_v13, %v596_v57 }
  0xfc   : > { %v642_v2 = vmax.f32 %v626_v56, 0.0  ;;  %v627_v4 = vadd.f32 %v1133_v13, %v604_v58  ;;  %v632_v5 = vmax.f32 %v616_v61, 0.0  ;;  %v617_v7 = vadd.f32 %v1133_v13, %v594_v63 }
  0xfd   : > { %v640_v6 = vmax.f32 %v624_v62, 0.0  ;;  %v625_v8 = vadd.f32 %v1133_v13, %v602_v0  ;;  %650 = vst [vmem:[%s1153_s30 + $0x30] sm:$0xff] %v634_v1  ;;  %v635_v9 = vmax.f32 %v619_v3, 0.0 }
  0xfe   : > { %658 = vst [vmem:[%s1153_s30 + $0x70] sm:$0xff] %v642_v2  ;;  %v643_v10 = vmax.f32 %v627_v4, 0.0  ;;  %648 = vst [vmem:[%s1153_s30 + $0x20] sm:$0xff] %v632_v5  ;;  %v633_v11 = vmax.f32 %v617_v7, 0.0 }
  0xff   : > { %656 = vst [vmem:[%s1153_s30 + $0x60] sm:$0xff] %v640_v6  ;;  %v641_v12 = vmax.f32 %v625_v8, 0.0  ;;  %651 = vst [vmem:[%s1153_s30 + $0x38] sm:$0xff] %v635_v9 }
 0x100   : > { %659 = vst [vmem:[%s1153_s30 + $0x78] sm:$0xff] %v643_v10  ;;  %649 = vst [vmem:[%s1153_s30 + $0x28] sm:$0xff] %v633_v11 }
 0x101   : > { %657 = vst [vmem:[%s1153_s30 + $0x68] sm:$0xff] %v641_v12 }
 0x102   : > { %953 = shalt.err (!%p950_p5)
}
 0x103   : > { %s954_s14 = scalar_lea.hbm %s1186_s8, 2048  ;;  %s958_s24 = scalar_lea.hbm %s1248_s4, 8192 }
 0x104   : > { %p955_p6 = scmp.ne.s32.totalorder %s1186_s8, %s954_s14  ;;  %p959_p10 = scmp.lt.u32.totalorder %s1186_s8, %s1248_s4 }
 0x105   : > { %p960_p11 = scmp.lt.u32.totalorder %s958_s24, %s954_s14  ;;  %p962_p13 = scmp.lt.u32.totalorder %s954_s14, %s1186_s8 }
 0x106   : > { %p956_p7 = pnand %p955_p6, %p1088_p4 }
 0x107   : > { %p961_p12 = por %p960_p11, %p959_p10 }
 0x108   : > { %p957_p9 = pneg %p956_p7 }
 0x109   : > { %p963_p0 = por %p962_p13, %p961_p12 }
 0x10b   : > { %p964_p1 = pnand %p963_p0, %p957_p9 }
 0x10d   : > { %967 = shalt.err (!%p964_p1)
}
 0x10e   : > { %s1021_s30 = smov 128   ;;  %s1022_s5 = smov 8  }
 0x10f   : > { %872 = dma.vmem_to_hbm [thread:$0]  (%p1088_p4), %s1188_s6, 2048, %s1186_s8, %s1198_s9, %s1021_s30, %s1021_s30, %s1022_s5  }
 0x110 PF: > { %p878_p2 = scmp.ge.s32.totalorder %s1018_s20, 2  ;;  %s690_s18 = sand.u32 1, %s998_s15  }
 0x111   : > { %s691_s7 = scalar_lea.sflag [#allocation4], %s690_s18 }
 0x112   : > { %p875_p3 = pnand %p878_p2, %p1095_p8 }
 0x114   : > { %993 = dma.done.wait (!%p875_p3), %s691_s7, 2048  }
 0x115   : > { %995 = vsyncadd (!%p875_p3), %s691_s7, 4294965248  ;;  %s17_s20 = sadd.s32 1, %s1018_s20   ;;  %s1251_s15 = smov %s1002_s16 }
 0x116   : > { %p14_p5 = scmp.ge.s32.totalorder %s17_s20, 6   ;;  %s1252_s16 = smov %s1006_s17 }
 0x117   : > { %s1253_s17 = smov %s1101_s28  ;;  %s1254_s18 = smov %s1014_s19 }
 0x118   : > { %s1255_s19 = smov %s1257_s23  ;;  %16 = sbr.rel (!%p14_p5) target bundleno = 4 (0x4), region = 88 }
 0x11f   :  { %696 = vsyncpa [#allocation4], 1 }
 0x120   :  { %698 = vsyncpa [#allocation4 + $0x1], 1 }

</bundles_post_ra>
